<compile_context>
chip_gen: v6e
topology: v6e:2x2x1
jax: 0.10.0
libtpu: 0.0.40
codegen_flags: <defaults>
</compile_context>

<pallas_src>
import functools

import jax
import jax.numpy as jnp
from jax.experimental import pallas as pl
from jax.experimental.pallas import tpu as pltpu


# ----------------------------------------------------------------------------
# tile-size helpers
# ----------------------------------------------------------------------------
def _pick_tile(dim, target, align):
    """Largest multiple of `align` <= target that divides `dim`; full dim if none."""
    if dim <= target:
        return dim
    t = (target // align) * align
    while t >= align:
        if dim % t == 0:
            return t
        t -= align
    return dim


def _pick_seq_tile(dim, target):
    """Largest divisor of `dim` <= target (axis not bound by the (8,128) rule)."""
    if dim <= target:
        return dim
    best = 1
    for t in range(target, 0, -1):
        if dim % t == 0:
            best = t
            break
    return best if best >= 8 else dim


# ----------------------------------------------------------------------------
# Linear: x (M,K) @ W_t (K,N) [+ b]  — tiled over (M, N, K), K accumulated
# ----------------------------------------------------------------------------
def _linear_nobias_kernel(x_ref, w_ref, o_ref, acc_ref):
    kk = pl.program_id(2)

    @pl.when(kk == 0)
    def _init():
        acc_ref[...] = jnp.zeros_like(acc_ref)

    acc_ref[...] += jnp.dot(x_ref[...], w_ref[...],
                            preferred_element_type=jnp.float32)

    @pl.when(kk == pl.num_programs(2) - 1)
    def _store():
        o_ref[...] = acc_ref[...].astype(o_ref.dtype)


def _linear_bias_kernel(x_ref, w_ref, b_ref, o_ref, acc_ref):
    kk = pl.program_id(2)

    @pl.when(kk == 0)
    def _init():
        acc_ref[...] = jnp.zeros_like(acc_ref)

    acc_ref[...] += jnp.dot(x_ref[...], w_ref[...],
                            preferred_element_type=jnp.float32)

    @pl.when(kk == pl.num_programs(2) - 1)
    def _store():
        o_ref[...] = (acc_ref[...] + b_ref[...]).astype(o_ref.dtype)


def _linear(x2d, w_in_out, bias=None, *, tm_target=512, tn_target=256,
            tk_target=512):
    """x2d (M, K) @ w_in_out (K, N_out) [+ bias] -> (M, N_out).

    Weight arrives pre-transposed to (in, out) (done once at init) so the MXU
    gets canonical (tm, tk) x (tk, tn) blocks with no per-tile transpose.
    K is a grid axis ("arbitrary") with an f32 VMEM accumulator so the
    per-step VMEM footprint stays small on v7x.
    """
    M, K = x2d.shape
    n_out = w_in_out.shape[1]
    tm = _pick_tile(M, tm_target, 8)        # sublane-aligned row tile (or full)
    tn = _pick_tile(n_out, tn_target, 128)  # lane-aligned output tile (or full)
    tk = _pick_tile(K, tk_target, 128)      # lane-aligned K tile (or full)
    grid = (M // tm, n_out // tn, K // tk)

    x_spec = pl.BlockSpec((tm, tk), lambda i, j, k: (i, k))
    w_spec = pl.BlockSpec((tk, tn), lambda i, j, k: (k, j))
    o_spec = pl.BlockSpec((tm, tn), lambda i, j, k: (i, j))
    cparams = pltpu.CompilerParams(
        dimension_semantics=("parallel", "parallel", "arbitrary"))
    out_shape = jax.ShapeDtypeStruct((M, n_out), x2d.dtype)
    scratch = [pltpu.VMEM((tm, tn), jnp.float32)]

    if bias is None:
        return pl.pallas_call(
            _linear_nobias_kernel,
            grid=grid,
            in_specs=[x_spec, w_spec],
            out_specs=o_spec,
            out_shape=out_shape,
            scratch_shapes=scratch,
            compiler_params=cparams,
        )(x2d, w_in_out)

    b2d = bias.reshape(1, n_out).astype(jnp.float32)
    b_spec = pl.BlockSpec((1, tn), lambda i, j, k: (0, j))
    return pl.pallas_call(
        _linear_bias_kernel,
        grid=grid,
        in_specs=[x_spec, w_spec, b_spec],
        out_specs=o_spec,
        out_shape=out_shape,
        scratch_shapes=scratch,
        compiler_params=cparams,
    )(x2d, w_in_out, b2d)


# ----------------------------------------------------------------------------
# Flash-style scaled-dot-product attention (online softmax over kv tiles)
# ----------------------------------------------------------------------------
def _flash_attn_kernel(q_ref, k_ref, v_ref, o_ref, q_sc, m_sc, l_sc, acc_sc, *,
                       scale):
    """Grid = (batch, q-tile, kv-tile); all heads processed per step.

    q_ref/k_ref/v_ref : (tq/tk, H, D) blocks straight from projection layout
    o_ref             : (tq, H*D) lane-dense output block
    q_sc              : (H, tq, D) activation-dtype scratch (scaled q, hoisted)
    m_sc, l_sc        : (H, tq) f32 online-softmax statistics (no lane padding)
    acc_sc            : (H, tq, D) f32 output accumulator
    """
    ki = pl.program_id(2)

    @pl.when(ki == 0)
    def _init():
        # hoist the q head-transpose and fold the softmax scale into q: done
        # once per q tile instead of once per kv step.
        q_sc[...] = (pltpu.einshape("nhd->hnd", q_ref[...]) * scale
                     ).astype(q_sc.dtype)
        m_sc[...] = jnp.full_like(m_sc, -jnp.inf)
        l_sc[...] = jnp.zeros_like(l_sc)
        acc_sc[...] = jnp.zeros_like(acc_sc)

    # cheap head-major shuffle of the kv tiles in VMEM (no HBM transposes).
    k = pltpu.einshape("nhd->hnd", k_ref[...])        # (H, tk, D)
    v = pltpu.einshape("nhd->hnd", v_ref[...])        # (H, tk, D)

    # scores for all heads at once; MXU inputs stay in the activation dtype.
    # (documented flash layout; Mosaic feeds the contracted-last-dim RHS to the
    #  MXU without materializing an extra K-tile transpose.)
    s = jnp.einsum("hqd,hkd->hqk", q_sc[...], k,
                   preferred_element_type=jnp.float32)            # (H, tq, tk)

    m_prev = m_sc[...]                                            # (H, tq)
    m_new = jnp.maximum(m_prev, jnp.max(s, axis=-1))              # (H, tq)
    alpha = jnp.exp(m_prev - m_new)                               # (H, tq)
    p = jnp.exp(s - m_new[..., None])                             # (H, tq, tk)
    l_sc[...] = alpha * l_sc[...] + jnp.sum(p, axis=-1)
    acc_sc[...] = alpha[..., None] * acc_sc[...] + jnp.einsum(
        "hqk,hkd->hqd", p.astype(v.dtype), v,
        preferred_element_type=jnp.float32)
    m_sc[...] = m_new

    @pl.when(ki == pl.num_programs(2) - 1)
    def _finalize():
        inv_l = pl.reciprocal(l_sc[...], approx=False)            # exact
        out = acc_sc[...] * inv_l[..., None]                      # (H, tq, D)
        out = pltpu.einshape("hnd->nhd", out)                     # (tq, H, D)
        # flatten heads into the lane dim -> one dense (tq, H*D) store
        o_ref[...] = out.reshape(o_ref.shape).astype(o_ref.dtype)


def _sdpa_scratch(H, tq, D, act_dtype):
    return [
        pltpu.VMEM((H, tq, D), act_dtype),     # scaled head-major q (hoisted)
        pltpu.VMEM((H, tq), jnp.float32),      # running max
        pltpu.VMEM((H, tq), jnp.float32),      # running sum
        pltpu.VMEM((H, tq, D), jnp.float32),   # output accumulator
    ]


# batch & q-tile axes parallel (megacore sharding on v7x needs B*Nq/tq >= 2),
# kv axis is the online-softmax reduction -> arbitrary.
_SDPA_SEMANTICS = pltpu.CompilerParams(
    dimension_semantics=("parallel", "parallel", "arbitrary"))


def _sdpa_self_fused(qkv5, *, scale, tq, tk):
    """qkv5: (B, N, 3, H, D) fused projection output (never transposed in HBM)."""
    B, N, _, H, D = qkv5.shape
    tq = _pick_tile(N, tq, 8)        # second-minor of the (tq, C) output block
    tk = _pick_seq_tile(N, tk)
    grid = (B, N // tq, N // tk)
    kern = functools.partial(_flash_attn_kernel, scale=scale)
    return pl.pallas_call(
        kern,
        grid=grid,
        in_specs=[
            pl.BlockSpec((None, tq, None, H, D), lambda b, qi, ki: (b, qi, 0, 0, 0)),
            pl.BlockSpec((None, tk, None, H, D), lambda b, qi, ki: (b, ki, 1, 0, 0)),
            pl.BlockSpec((None, tk, None, H, D), lambda b, qi, ki: (b, ki, 2, 0, 0)),
        ],
        out_specs=pl.BlockSpec((None, tq, H * D), lambda b, qi, ki: (b, qi, 0)),
        out_shape=jax.ShapeDtypeStruct((B, N, H * D), qkv5.dtype),
        scratch_shapes=_sdpa_scratch(H, tq, D, qkv5.dtype),
        compiler_params=_SDPA_SEMANTICS,
    )(qkv5, qkv5, qkv5)


def _sdpa_cross_fusedkv(qh, kv5, *, scale, tq, tk):
    """qh: (B, Nq, H, D); kv5: (B, Nk, 2, H, D) fused K/V projection output."""
    B, Nq, H, D = qh.shape
    Nk = kv5.shape[1]
    tq = _pick_tile(Nq, tq, 8)
    tk = _pick_seq_tile(Nk, tk)
    grid = (B, Nq // tq, Nk // tk)
    kern = functools.partial(_flash_attn_kernel, scale=scale)
    return pl.pallas_call(
        kern,
        grid=grid,
        in_specs=[
            pl.BlockSpec((None, tq, H, D), lambda b, qi, ki: (b, qi, 0, 0)),
            pl.BlockSpec((None, tk, None, H, D), lambda b, qi, ki: (b, ki, 0, 0, 0)),
            pl.BlockSpec((None, tk, None, H, D), lambda b, qi, ki: (b, ki, 1, 0, 0)),
        ],
        out_specs=pl.BlockSpec((None, tq, H * D), lambda b, qi, ki: (b, qi, 0)),
        out_shape=jax.ShapeDtypeStruct((B, Nq, H * D), qh.dtype),
        scratch_shapes=_sdpa_scratch(H, tq, D, qh.dtype),
        compiler_params=_SDPA_SEMANTICS,
    )(qh, kv5, kv5)


# ----------------------------------------------------------------------------
# Params + module-level forward
# ----------------------------------------------------------------------------
def init_attention_params(key, dim):
    """Synthetic params. PyTorch (out, in) layout kept for the reference; kernel
    layouts (weights transposed to (in, out), cross-attn K/V weights fused) are
    precomputed ONCE here — free at inference time."""
    k1, k2, k3 = jax.random.split(key, 3)
    qkv_w = jax.random.normal(k1, (3 * dim, dim), jnp.float32) * 0.02
    proj_w = jax.random.normal(k2, (dim, dim), jnp.float32) * 0.02
    proj_b = jax.random.normal(k3, (dim,), jnp.float32) * 0.02
    return {
        # reference (PyTorch) layout
        "qkv_w": qkv_w, "proj_w": proj_w, "proj_b": proj_b,
        # kernel layout: (in, out), pre-sliced for cross-attention
        "qkv_w_t": qkv_w.T,            # (C, 3C)  fused qkv (self-attention)
        "q_w_t": qkv_w[:dim].T,        # (C, C)   q projection (cross)
        "kv_w_t": qkv_w[dim:].T,       # (C, 2C)  fused k+v projection (cross)
        "proj_w_t": proj_w.T,          # (C, C)
    }


def attention_forward(params, q, kv=None, num_heads=8, qk_scale=None,
                      q_block=256, kv_block=128):
    """Pallas forward of Attention.forward(q, kv). Returns (out, None)."""
    B, Nq, C = q.shape
    H = num_heads
    D = C // H
    scale = qk_scale if qk_scale is not None else D ** -0.5

    if kv is None:
        # self-attention: fused qkv projection (qkv_bias=False -> no bias DMA)
        qkv = _linear(q.reshape(B * Nq, C), params["qkv_w_t"], None)   # (B*Nq, 3C)
        qkv5 = qkv.reshape(B, Nq, 3, H, D)                             # free reshape
        x = _sdpa_self_fused(qkv5, scale=scale, tq=q_block, tk=kv_block)  # (B,Nq,C)
    else:
        # cross-attention: q projection + single fused K/V projection
        Nk = kv.shape[1]
        qh = _linear(q.reshape(B * Nq, C), params["q_w_t"], None
                     ).reshape(B, Nq, H, D)
        kvp = _linear(kv.reshape(B * Nk, C), params["kv_w_t"], None)   # (B*Nk, 2C)
        kv5 = kvp.reshape(B, Nk, 2, H, D)                              # free reshape
        x = _sdpa_cross_fusedkv(qh, kv5, scale=scale, tq=q_block, tk=kv_block)

    x = _linear(x.reshape(B * Nq, C), params["proj_w_t"], params["proj_b"])
    x = x.reshape(B, Nq, C)
    # TODO(synk): attn_drop / proj_drop are identity at p=0.0 (inference); not implemented.
    return x, None   # flash path of the reference returns _attn=None


# ----------------------------------------------------------------------------
# Pure-JAX reference (mirrors the PyTorch math) for a correctness check
# ----------------------------------------------------------------------------
def _reference_forward(params, q, kv=None, num_heads=8):
    B, Nq, C = q.shape
    H, D = num_heads, C // num_heads
    scale = D ** -0.5
    W = params["qkv_w"]
    if kv is None:
        qkv = q @ W.T
        qkv = qkv.reshape(B, Nq, 3, H, D).transpose(2, 0, 3, 1, 4)
        qh, kh, vh = qkv[0], qkv[1], qkv[2]
    else:
        Nk = kv.shape[1]
        qh = (q @ W[:C].T).reshape(B, Nq, H, D).transpose(0, 2, 1, 3)
        kh = (kv @ W[C:2 * C].T).reshape(B, Nk, H, D).transpose(0, 2, 1, 3)
        vh = (kv @ W[2 * C:].T).reshape(B, Nk, H, D).transpose(0, 2, 1, 3)
    s = jnp.einsum("bhnd,bhmd->bhnm", qh, kh) * scale
    p = jax.nn.softmax(s, axis=-1)
    o = jnp.einsum("bhnm,bhmd->bhnd", p, vh)
    x = o.transpose(0, 2, 1, 3).reshape(B, Nq, C)
    return x @ params["proj_w"].T + params["proj_b"]


if __name__ == "__main__":
    B, N, NKV, C, H = 2, 16, 24, 32, 8      # dim=32, num_heads=8, head_dim=4
    key = jax.random.PRNGKey(0)
    kp, kx, kkv = jax.random.split(key, 3)

    params = init_attention_params(kp, C)
    x = jax.random.normal(kx, (B, N, C), jnp.float32)
    kv = jax.random.normal(kkv, (B, NKV, C), jnp.float32)

    # small kv_block so the online-softmax (flash) loop runs over several kv tiles
    out_self, attn_self = attention_forward(params, x, kv=None, num_heads=H,
                                            kv_block=8)
    out_self = jax.block_until_ready(out_self)
    ref_self = _reference_forward(params, x, kv=None, num_heads=H)
    assert attn_self is None
    assert jnp.allclose(out_self, ref_self, atol=1e-3, rtol=1e-3), \
        "self-attention mismatch"

    out_cross, attn_cross = attention_forward(params, x, kv=kv, num_heads=H,
                                              kv_block=8)
    out_cross = jax.block_until_ready(out_cross)
    ref_cross = _reference_forward(params, x, kv=kv, num_heads=H)
    assert attn_cross is None
    assert jnp.allclose(out_cross, ref_cross, atol=1e-3, rtol=1e-3), \
        "cross-attention mismatch"

    print("KERNEL_OK")
</pallas_src>

<mosaic_0001>
module attributes {stable_mosaic.version = 11 : i64} {
  func.func @_linear_nobias_kernel(%arg0: i32, %arg1: i32, %arg2: i32, %arg3: memref<32x32xf32, #tpu.memory_space<vmem>>, %arg4: memref<32x96xf32, #tpu.memory_space<vmem>>, %arg5: memref<32x96xf32, #tpu.memory_space<vmem>>, %arg6: memref<32x96xf32, #tpu.memory_space<vmem>>) attributes {dimension_semantics = [#tpu.dimension_semantics<parallel>, #tpu.dimension_semantics<parallel>, #tpu.dimension_semantics<arbitrary>], iteration_bounds = array<i64: 1, 1, 1>, scalar_prefetch = 0 : i64, scratch_operands = 1 : i64, tpu.core_type = #tpu.core_type<tc>, window_params = [{transform_indices = @transform_0, window_bounds = array<i64: 32, 32>}, {transform_indices = @transform_1, window_bounds = array<i64: 32, 96>}, {transform_indices = @transform_2, window_bounds = array<i64: 32, 96>}]} {
    %c0_i32 = arith.constant 0 : i32
    %0 = arith.cmpi eq, %arg2, %c0_i32 : i32
    %1 = arith.extui %0 : i1 to i32
    %c0_i32_0 = arith.constant 0 : i32
    %2 = arith.cmpi ne, %1, %c0_i32_0 : i32
    scf.if %2 {
      %cst_10 = arith.constant 0.000000e+00 : f32
      %12 = vector.broadcast %cst_10 : f32 to vector<32x96xf32>
      %c0_11 = arith.constant 0 : index
      %c0_12 = arith.constant 0 : index
      %13 = vector.load %arg6[%c0_11, %c0_12] : memref<32x96xf32, #tpu.memory_space<vmem>>, vector<32x96xf32>
      tpu.vector_store %arg6[%c0_11, %c0_12], %12 {strides = array<i32>} : memref<32x96xf32, #tpu.memory_space<vmem>>, vector<32x96xf32>,
    } else {
    }
    %c0 = arith.constant 0 : index
    %c0_1 = arith.constant 0 : index
    %3 = vector.load %arg6[%c0, %c0_1] : memref<32x96xf32, #tpu.memory_space<vmem>>, vector<32x96xf32>
    %c0_2 = arith.constant 0 : index
    %c0_3 = arith.constant 0 : index
    %4 = vector.load %arg3[%c0_2, %c0_3] : memref<32x32xf32, #tpu.memory_space<vmem>>, vector<32x32xf32>
    %c0_4 = arith.constant 0 : index
    %c0_5 = arith.constant 0 : index
    %5 = vector.load %arg4[%c0_4, %c0_5] : memref<32x96xf32, #tpu.memory_space<vmem>>, vector<32x96xf32>
    %cst = arith.constant dense<0.000000e+00> : vector<32x96xf32>
    %6 = tpu.matmul %4, %5, %cst {dimension_numbers = #tpu.dot_dimension_numbers<[1], [0], [0], [1], [0, 0, 1, 1], [], []>} : vector<32x32xf32>, vector<32x96xf32>, vector<32x96xf32> -> vector<32x96xf32>
    %7 = arith.addf %3, %6 : vector<32x96xf32>
    %c0_6 = arith.constant 0 : index
    %c0_7 = arith.constant 0 : index
    %8 = vector.load %arg6[%c0_6, %c0_7] : memref<32x96xf32, #tpu.memory_space<vmem>>, vector<32x96xf32>
    tpu.vector_store %arg6[%c0_6, %c0_7], %7 {strides = array<i32>} : memref<32x96xf32, #tpu.memory_space<vmem>>, vector<32x96xf32>,
    %c0_i32_8 = arith.constant 0 : i32
    %9 = arith.cmpi eq, %arg2, %c0_i32_8 : i32
    %10 = arith.extui %9 : i1 to i32
    %c0_i32_9 = arith.constant 0 : i32
    %11 = arith.cmpi ne, %10, %c0_i32_9 : i32
    scf.if %11 {
      %c0_10 = arith.constant 0 : index
      %c0_11 = arith.constant 0 : index
      %12 = vector.load %arg6[%c0_10, %c0_11] : memref<32x96xf32, #tpu.memory_space<vmem>>, vector<32x96xf32>
      %c0_12 = arith.constant 0 : index
      %c0_13 = arith.constant 0 : index
      %13 = vector.load %arg5[%c0_12, %c0_13] : memref<32x96xf32, #tpu.memory_space<vmem>>, vector<32x96xf32>
      tpu.vector_store %arg5[%c0_12, %c0_13], %12 {strides = array<i32>} : memref<32x96xf32, #tpu.memory_space<vmem>>, vector<32x96xf32>,
    } else {
    }
    return
  }
  func.func @transform_0(%arg0: i32, %arg1: i32, %arg2: i32) -> (i32, i32) {
    %c0_i32 = arith.constant 0 : i32
    return %arg0, %arg2 : i32, i32
  }
  func.func @transform_1(%arg0: i32, %arg1: i32, %arg2: i32) -> (i32, i32) {
    %c0_i32 = arith.constant 0 : i32
    return %arg2, %arg1 : i32, i32
  }
  func.func @transform_2(%arg0: i32, %arg1: i32, %arg2: i32) -> (i32, i32) {
    %c0_i32 = arith.constant 0 : i32
    return %arg0, %arg1 : i32, i32
  }
}

</mosaic_0001>

<bundles_post_ra>
// kernel: tpu_custom_call.1
= control target key start
LH: loop header
LB: loop body
LE: loop exit
PB: predicated region body
PF: predicated region fallthrough
CT: control target
= control target key end

     0   :  { %7 = vsyncpa [#allocation4], 0  ;;  %s354_s0 = inlined_call_operand.hbm [shape: f32[32,32], index: 0, kind: input, shape index: {}]   ;;  %s355_s1 = inlined_call_operand.hbm [shape: f32[32,96], index: 1, kind: input, shape index: {}]   ;;  %s356_s2 = inlined_call_operand.hbm [shape: f32[32,96], index: 2, kind: output, shape index: {}]  }
   0x1   :  { %8 = vsyncpa [#allocation7], 0 }
   0x2   :  { %9 = vsyncpa [#allocation5], 0  ;;  %s303_s9 = smov [#allocation3]  }
   0x3   :  { %s15_s10 = sshll.u32 %s303_s9, 4  ;;  %s16_s10 = int_to_ptr.vmem [resolvable:$true] %s15_s10 }
   0x4   :  { %s245_s11 = scalar_lea.vmem %s16_s10, 512  ;;  %p250_p1 = scmp.lt.s32.totalorder %s16_s10, %s16_s10 }
   0x5   :  { %p246_p0 = scmp.ne.s32.totalorder %s16_s10, %s245_s11  ;;  %p251_p2 = scmp.lt.s32.totalorder %s245_s11, %s245_s11 }
   0x7   :  { %p252_p3 = por %p251_p2, %p250_p1 }
   0x9   :  { %p253_p4 = pnand %p252_p3, %p246_p0 }
   0xb   :  { %256 = shalt.err (!%p253_p4)
}
   0xc   :  { %s304_s12 = smov 128   ;;  %s305_s13 = smov 8  }
   0xd   :  { %21 = dma.hbm_to_vmem [thread:$0]  %s354_s0, 512, %s16_s10, [#allocation4], %s304_s12, %s304_s12, %s305_s13  }
   0xe   :  { %s306_s16 = smov [#allocation6]  }
   0xf   :  { %s27_s17 = sshll.u32 %s306_s16, 4  ;;  %s28_s17 = int_to_ptr.vmem [resolvable:$true] %s27_s17 }
  0x10   :  { %s265_s18 = scalar_lea.vmem %s28_s17, 512  ;;  %p270_p6 = scmp.lt.s32.totalorder %s28_s17, %s28_s17 }
  0x11   :  { %p266_p5 = scmp.ne.s32.totalorder %s28_s17, %s265_s18  ;;  %p271_p7 = scmp.lt.s32.totalorder %s265_s18, %s265_s18 }
  0x13   :  { %p272_p8 = por %p271_p7, %p270_p6 }
  0x15   :  { %p273_p9 = pnand %p272_p8, %p266_p5 }
  0x17   :  { %276 = shalt.err (!%p273_p9)
}
  0x18   :  { %33 = dma.hbm_to_vmem [thread:$0]  %s355_s1, 512, %s28_s17, [#allocation7], %s304_s12, %s304_s12, %s305_s13  }
  0x19   :  { %297 = dma.done.wait [#allocation4], 512  }
  0x1a   :  { %298 = vsyncadd [#allocation4], 4294966784 }
  0x1b   :  { %299 = dma.done.wait [#allocation7], 512  }
  0x1c   :  { %300 = vsyncadd [#allocation7], 4294966784  ;;  %vm44_vm0 = vcmask 785408   ;;  %v307_v0 = vmov 0.0   ;;  %v60_v1 = vld [vmem:[#allocation6 + $0x18] sm:$0xff]  ;;  %v59_v2 = vld [vmem:[#allocation6 + $0x10] sm:$0xff] }
  0x1d   :  { %46 = vst.msk [vmem:[#allocation2 + $0x8] sm:$0xff] %vm44_vm0, %v307_v0  ;;  %45 = vst.msk [vmem:[#allocation2] sm:$0xff] %vm44_vm0, %v307_v0  ;;  %209 = vmatprep.subr.mxu0 %v60_v1  ;;  %223 = vmatprep.subr.mxu1 %v60_v1  ;;  %v58_v3 = vld [vmem:[#allocation6 + $0x8] sm:$0xff]  ;;  %v57_v4 = vld [vmem:[#allocation6] sm:$0xff]  ;;  %vm61_vm1 = vcmask 261120   ;;  %s308_s0 = smov [#allocation8]  }
  0x1e   :  { %47 = vst.msk [vmem:[#allocation2 + $0x10] sm:$0xff] %vm44_vm0, %v307_v0  ;;  %48 = vst.msk [vmem:[#allocation2 + $0x18] sm:$0xff] %vm44_vm0, %v307_v0  ;;  %210 = vmatpush3.msra.mxu0 %v60_v1  ;;  %227 = vmatpush3.msra.mxu1 %v60_v1  ;;  %v53_v5 = vld [vmem:[#allocation3] sm:$0xff]  ;;  %v55_v6 = vld [vmem:[#allocation3 + $0x10] sm:$0xff]  ;;  %s184_s1 = sshll.u32 %s308_s0, 4  ;;  %s185_s1 = int_to_ptr.vmem [resolvable:$true] %s184_s1 }
  0x1f   :  { %211 = vmatprep.subr.mxu0 %v59_v2  ;;  %224 = vmatprep.subr.mxu1 %v59_v2  ;;  %v54_v7 = vld [vmem:[#allocation3 + $0x8] sm:$0xff]  ;;  %v56_v8 = vld [vmem:[#allocation3 + $0x18] sm:$0xff]  ;;  %s277_s21 = scalar_lea.vmem %s185_s1, 512  ;;  %p282_p11 = scmp.lt.s32.totalorder %s185_s1, %s185_s1 }
  0x20   :  { %212 = vmatpush3.msra.mxu0 %v59_v2  ;;  %228 = vmatpush3.msra.mxu1 %v59_v2  ;;  %p278_p10 = scmp.ne.s32.totalorder %s185_s1, %s277_s21  ;;  %p283_p12 = scmp.lt.s32.totalorder %s277_s21, %s277_s21 }
  0x21   :  { %213 = vmatprep.subr.mxu0 %v58_v3  ;;  %225 = vmatprep.subr.mxu1 %v58_v3 }
  0x22   :  { %214 = vmatpush3.msra.mxu0 %v58_v3  ;;  %229 = vmatpush3.msra.mxu1 %v58_v3  ;;  %p284_p13 = por %p283_p12, %p282_p11 }
  0x23   :  { %215 = vmatprep.subr.mxu0 %v57_v4  ;;  %226 = vmatprep.subr.mxu1 %v57_v4 }
  0x24   :  { %216 = vmatpush3.msra.mxu0 %v57_v4  ;;  %230 = vmatpush3.msra.mxu1 %v57_v4  ;;  %v50_v9 = vld [vmem:[#allocation2 + $0x8] sm:$0xff]  ;;  %v49_v13 = vld [vmem:[#allocation2] sm:$0xff]  ;;  %p285_p0 = pnand %p284_p13, %p278_p10 }
  0x25   :  { %217 = vmatprep.mubr.msk.f32.mxu0 %vm61_vm1, %v53_v5  ;;  %220 = vmatprep.mubr.msk.f32.mxu1 %vm61_vm1, %v55_v6  ;;  %v52_v10 = vld [vmem:[#allocation2 + $0x18] sm:$0xff]  ;;  %v51_v14 = vld [vmem:[#allocation2 + $0x10] sm:$0xff] }
  0x26   :  { %218 = vmatmul.mubr.msk.f32.vlgmr.msra.gmra.mxu0 %vm61_vm1, %v54_v7  ;;  %221 = vmatmul.mubr.msk.f32.vlgmr.msra.gmra.mxu1 %vm61_vm1, %v56_v8 }
  0xe6   :  { %v219_v11 = vpop.f32.mrf.mxu0  ;;  %v222_v12 = vpop.f32.mrf.mxu1 }
  0xe7   :  { %v160_v15 = vadd.f32 %v219_v11, %v50_v9  ;;  %v162_v16 = vadd.f32 %v222_v12, %v52_v10 }
  0xe8   :  { %v140_v17 = vpop.f32.mrf.mxu0  ;;  %v150_v18 = vpop.f32.mrf.mxu1 }
  0xe9   :  { %165 = vst.msk [vmem:[#allocation2 + $0x8] sm:$0xff] %vm44_vm0, %v160_v15  ;;  %167 = vst.msk [vmem:[#allocation2 + $0x18] sm:$0xff] %vm44_vm0, %v162_v16  ;;  %v159_v19 = vadd.f32 %v140_v17, %v49_v13  ;;  %v161_v20 = vadd.f32 %v150_v18, %v51_v14 }
  0xeb   :  { %164 = vst.msk [vmem:[#allocation2] sm:$0xff] %vm44_vm0, %v159_v19  ;;  %166 = vst.msk [vmem:[#allocation2 + $0x10] sm:$0xff] %vm44_vm0, %v161_v20 }
  0xf0   :  { %v172_v21 = vld [vmem:[#allocation2 + $0x8] sm:$0xff]  ;;  %v174_v22 = vld [vmem:[#allocation2 + $0x18] sm:$0xff] }
  0xf1   :  { %176 = vst.msk [vmem:[#allocation8 + $0x8] sm:$0xff] %vm44_vm0, %v172_v21  ;;  %178 = vst.msk [vmem:[#allocation8 + $0x18] sm:$0xff] %vm44_vm0, %v174_v22 }
  0xf2   :  { %v171_v23 = vld [vmem:[#allocation2] sm:$0xff]  ;;  %v173_v24 = vld [vmem:[#allocation2 + $0x10] sm:$0xff] }
  0xf3   :  { %175 = vst.msk [vmem:[#allocation8] sm:$0xff] %vm44_vm0, %v171_v23  ;;  %177 = vst.msk [vmem:[#allocation8 + $0x10] sm:$0xff] %vm44_vm0, %v173_v24 }
  0xf4   :  { %288 = shalt.err (!%p285_p0)
}
  0xf5   :  { %190 = dma.vmem_to_hbm [thread:$0]  %s185_s1, 512, %s356_s2, [#allocation5], %s304_s12, %s304_s12, %s305_s13  }
  0xf6   :  { %301 = dma.done.wait [#allocation5], 512  }
  0xf7   :  { %302 = vsyncadd [#allocation5], 4294966784 }
  0xf8   :  { %194 = vsyncpa [#allocation4], 1 }
  0xf9   :  { %195 = vsyncpa [#allocation7], 1 }
  0xfa   :  { %196 = vsyncpa [#allocation5], 1 }

</bundles_post_ra>
